<compile_context>
chip_gen: v6e
topology: v6e:2x2x1
jax: 0.10.0
libtpu: 0.0.40
codegen_flags: <defaults>
</compile_context>

<pallas_src>
import functools

import jax
import jax.numpy as jnp
from jax.experimental import pallas as pl
from jax.experimental.pallas import tpu as pltpu


def conv_stats_kernel(x_ref, wt_ref, y_ref, stats_ref, *, TH, Wo, Cin, Cout, KS):
    """One grid step = one (image, row-tile).

    x_ref:     (1, 1, TH+KS-1, Wp, Cin)  padded input rows for this tile (incl. halo)
    wt_ref:    (Cout, KS*KS*Cin)         conv weight, (ky, kx, ci) flattened
    y_ref:     (1, Cout, TH*Wo)          conv output tile, channel-major / lane-dense
    stats_ref: (1, 1, Cout, 2)           per-block [sum, centered M2] partial stats
    """
    xt = x_ref[0, 0]                                      # (TH+KS-1, Wp, Cin)

    # im2col: build the (TH*Wo, KS*KS*Cin) patch matrix once, then a single MXU
    # contraction (instead of KS*KS small, latency-bound matmuls).
    cols = []
    for ky in range(KS):
        for kx in range(KS):
            cols.append(xt[ky:ky + TH, kx:kx + Wo, :].reshape(TH * Wo, Cin))
    patch = jnp.concatenate(cols, axis=1)                 # (TH*Wo, KS*KS*Cin)

    # (Cout, K) . (TH*Wo, K)^T -> (Cout, TH*Wo): channel-major result so the
    # store below is an unmasked, lane-dense vst (TH*Wo % 128 == 0).
    acc = jax.lax.dot_general(
        wt_ref[...], patch,
        dimension_numbers=(((1,), (1,)), ((), ())),
        preferred_element_type=jnp.float32)               # (Cout, TH*Wo)
    y_ref[0] = acc

    # Per-block BatchNorm partial statistics.  (sum, centered M2) instead of
    # (sum, sum-of-squares) avoids E[x^2]-E[x]^2 cancellation when combining.
    inv_cnt = 1.0 / (TH * Wo)
    s = jnp.sum(acc, axis=1, keepdims=True)               # (Cout, 1)
    m2 = jnp.sum((acc - s * inv_cnt) ** 2, axis=1, keepdims=True)
    stats_ref[0, 0] = jnp.concatenate([s, m2], axis=1)    # single (Cout, 2) store


def bn_relu_kernel(y_ref, scale_ref, bias_ref, o_ref):
    """BN affine-apply + ReLU, in place over one lane-dense conv-output tile."""
    o_ref[0] = jnp.maximum(y_ref[0] * scale_ref[...] + bias_ref[...], 0.0)


def _pick_row_tile(Ho, Wo, cap=64):
    """Largest TH <= cap with Ho % TH == 0 and (TH*Wo) % 128 == 0 (lane-dense blocks).

    Keeps per-step VMEM bounded; use a smaller `cap` on v7x (64 MiB VMEM).
    """
    for t in range(min(cap, Ho), 0, -1):
        if Ho % t == 0 and (t * Wo) % 128 == 0:
            return t
    return Ho  # single row tile: full-dim blocks are always legal


def conv_bn_relu(x_nchw, w_oihw, gamma, beta, *, eps=1e-5, padding=1, stride=1,
                 row_tile=None, row_tile_cap=64):
    """ConvBNReLU forward. Input/output are NCHW float32 (PyTorch convention)."""
    assert stride == 1, "only stride=1 supported (module default)"
    N, Cin, H, W = x_nchw.shape
    Cout, Cin_w, KS, KS2 = w_oihw.shape
    assert Cin_w == Cin and KS == KS2

    Ho = H + 2 * padding - KS + 1
    Wo = W + 2 * padding - KS + 1
    Wp = W + 2 * padding

    TH = _pick_row_tile(Ho, Wo, row_tile_cap) if row_tile is None else row_tile
    assert Ho % TH == 0 and ((TH * Wo) % 128 == 0 or TH == Ho), "bad row_tile"
    nH = Ho // TH
    THK = TH + KS - 1

    # --- glue (one fused XLA copy): NCHW->NHWC, zero-pad, halo-duplicated row tiles.
    x_nhwc = jnp.transpose(x_nchw, (0, 2, 3, 1)).astype(jnp.float32)
    xp = jnp.pad(x_nhwc, ((0, 0), (padding, padding), (padding, padding), (0, 0)))
    x_tiles = jnp.stack([xp[:, h * TH:h * TH + THK] for h in range(nH)], axis=1)
    # x_tiles: (N, nH, THK, Wp, Cin)

    # Weight flattened to (Cout, KS*KS*Cin), (ky, kx, ci) ordering matches im2col cols.
    w_t = jnp.transpose(w_oihw, (0, 2, 3, 1)).reshape(Cout, KS * KS * Cin)
    w_t = w_t.astype(jnp.float32)

    # --- Kernel A: conv + partial batch stats; grid over (batch, row tiles),
    # both axes parallel (no serialized accumulator -> both v7x TCs usable).
    kern_a = functools.partial(conv_stats_kernel,
                               TH=TH, Wo=Wo, Cin=Cin, Cout=Cout, KS=KS)
    y, stats = pl.pallas_call(
        kern_a,
        out_shape=(jax.ShapeDtypeStruct((N, Cout, Ho * Wo), jnp.float32),
                   jax.ShapeDtypeStruct((N, nH, Cout, 2), jnp.float32)),
        grid=(N, nH),
        in_specs=[
            pl.BlockSpec((1, 1, THK, Wp, Cin), lambda n, h: (n, h, 0, 0, 0)),
            pl.BlockSpec((Cout, KS * KS * Cin), lambda n, h: (0, 0)),
        ],
        out_specs=(
            pl.BlockSpec((1, Cout, TH * Wo), lambda n, h: (n, 0, h)),
            pl.BlockSpec((1, 1, Cout, 2), lambda n, h: (n, h, 0, 0)),
        ),
        compiler_params=pltpu.CompilerParams(
            dimension_semantics=("parallel", "parallel")),
    )(x_tiles, w_t)

    # --- glue: combine per-block (sum, M2) with Chan's parallel-variance formula
    # (numerically robust), then fold batch stats with the BN affine params.
    cnt_blk = TH * Wo
    total = N * nH * cnt_blk                            # = N * Ho * Wo
    sums = stats[..., 0]                                # (N, nH, Cout)
    m2s = stats[..., 1]
    mean = jnp.sum(sums, axis=(0, 1)) / total           # (Cout,)
    bmean = sums / cnt_blk
    m2 = jnp.sum(m2s, axis=(0, 1)) + cnt_blk * jnp.sum((bmean - mean) ** 2, axis=(0, 1))
    var = m2 / total                                    # biased, PyTorch BN training
    scale = gamma.astype(jnp.float32) / jnp.sqrt(var + eps)
    bias = beta.astype(jnp.float32) - mean * scale

    # --- Kernel B: BN apply + ReLU, in place over y (aliased), lane-dense layout.
    out_flat = pl.pallas_call(
        bn_relu_kernel,
        out_shape=jax.ShapeDtypeStruct((N, Cout, Ho * Wo), jnp.float32),
        grid=(N, nH),
        in_specs=[
            pl.BlockSpec((1, Cout, TH * Wo), lambda n, h: (n, 0, h)),
            pl.BlockSpec((Cout, 1), lambda n, h: (0, 0)),
            pl.BlockSpec((Cout, 1), lambda n, h: (0, 0)),
        ],
        out_specs=pl.BlockSpec((1, Cout, TH * Wo), lambda n, h: (n, 0, h)),
        input_output_aliases={0: 0},
        compiler_params=pltpu.CompilerParams(
            dimension_semantics=("parallel", "parallel")),
    )(y, scale.reshape(Cout, 1), bias.reshape(Cout, 1))

    # (N, Cout, Ho*Wo) -> (N, Cout, Ho, Wo) is contiguous: free metadata reshape,
    # no extra HBM transpose pass.
    return out_flat.reshape(N, Cout, Ho, Wo)


def reference(x_nchw, w_oihw, gamma, beta, eps=1e-5):
    """Pure-JAX reference matching PyTorch ConvBNReLU.forward in training mode."""
    y = jax.lax.conv_general_dilated(
        x_nchw, w_oihw, window_strides=(1, 1), padding=((1, 1), (1, 1)),
        dimension_numbers=('NCHW', 'OIHW', 'NCHW'))
    mean = y.mean(axis=(0, 2, 3), keepdims=True)
    var = y.var(axis=(0, 2, 3), keepdims=True)          # biased, like BN training
    yn = (y - mean) / jnp.sqrt(var + eps)
    yn = yn * gamma.reshape(1, -1, 1, 1) + beta.reshape(1, -1, 1, 1)
    return jnp.maximum(yn, 0.0)


if __name__ == "__main__":
    key = jax.random.PRNGKey(0)
    k_x, k_w = jax.random.split(key)

    # Small shapes consistent with the module: Conv2d(in=4, out=8, ks=3, pad=1).
    N, Cin, H, W = 2, 4, 16, 16
    Cout, KS = 8, 3

    x = jax.random.normal(k_x, (N, Cin, H, W), dtype=jnp.float32)

    # kaiming_normal_(a=1): gain = sqrt(2/(1+1)) = 1, std = 1/sqrt(fan_in)
    fan_in = Cin * KS * KS
    w = jax.random.normal(k_w, (Cout, Cin, KS, KS), dtype=jnp.float32) / jnp.sqrt(
        jnp.float32(fan_in))
    gamma = jnp.ones((Cout,), jnp.float32)   # BatchNorm2d default affine init
    beta = jnp.zeros((Cout,), jnp.float32)

    # row_tile=8 -> 2 row tiles per image, exercising the (batch, row) grid.
    fwd = jax.jit(functools.partial(conv_bn_relu, row_tile=8))
    out = jax.block_until_ready(fwd(x, w, gamma, beta))

    ref = reference(x, w, gamma, beta)
    max_err = float(jnp.max(jnp.abs(out - ref)))
    assert jnp.allclose(out, ref, atol=2e-4, rtol=2e-4), f"max abs err {max_err}"

    print("KERNEL_OK")
</pallas_src>

<mosaic_0001>
module attributes {stable_mosaic.version = 11 : i64} {
  func.func @conv_stats_kernel(%arg0: i32, %arg1: i32, %arg2: memref<1x1x10x18x4xf32, #tpu.memory_space<vmem>>, %arg3: memref<8x36xf32, #tpu.memory_space<vmem>>, %arg4: memref<1x8x128xf32, #tpu.memory_space<vmem>>, %arg5: memref<1x1x8x2xf32, #tpu.memory_space<vmem>>) attributes {dimension_semantics = [#tpu.dimension_semantics<parallel>, #tpu.dimension_semantics<parallel>], iteration_bounds = array<i64: 2, 2>, scalar_prefetch = 0 : i64, scratch_operands = 0 : i64, tpu.core_type = #tpu.core_type<tc>, window_params = [{transform_indices = @transform_0, window_bounds = array<i64: 1, 1, 10, 18, 4>}, {pipeline_mode = #tpu.pipeline_mode<synchronous>, transform_indices = @transform_1, window_bounds = array<i64: 8, 36>}, {transform_indices = @transform_2, window_bounds = array<i64: 1, 8, 128>}, {transform_indices = @transform_3, window_bounds = array<i64: 1, 1, 8, 2>}]} {
    %c0 = arith.constant 0 : index
    %c0_0 = arith.constant 0 : index
    %c0_1 = arith.constant 0 : index
    %c0_2 = arith.constant 0 : index
    %c0_3 = arith.constant 0 : index
    %0 = vector.load %arg2[%c0, %c0_0, %c0_1, %c0_2, %c0_3] : memref<1x1x10x18x4xf32, #tpu.memory_space<vmem>>, vector<1x1x10x18x4xf32>
    %1 = vector.shape_cast %0 : vector<1x1x10x18x4xf32> to vector<10x18x4xf32>
    %2 = vector.extract_strided_slice %1 {offsets = [0, 0, 0], sizes = [8, 16, 4], strides = [1, 1, 1]} : vector<10x18x4xf32> to vector<8x16x4xf32>
    %3 = vector.shape_cast %2 : vector<8x16x4xf32> to vector<128x4xf32>
    %4 = vector.extract_strided_slice %1 {offsets = [0, 1, 0], sizes = [8, 16, 4], strides = [1, 1, 1]} : vector<10x18x4xf32> to vector<8x16x4xf32>
    %5 = vector.shape_cast %4 : vector<8x16x4xf32> to vector<128x4xf32>
    %6 = vector.extract_strided_slice %1 {offsets = [0, 2, 0], sizes = [8, 16, 4], strides = [1, 1, 1]} : vector<10x18x4xf32> to vector<8x16x4xf32>
    %7 = vector.shape_cast %6 : vector<8x16x4xf32> to vector<128x4xf32>
    %8 = vector.extract_strided_slice %1 {offsets = [1, 0, 0], sizes = [8, 16, 4], strides = [1, 1, 1]} : vector<10x18x4xf32> to vector<8x16x4xf32>
    %9 = vector.shape_cast %8 : vector<8x16x4xf32> to vector<128x4xf32>
    %10 = vector.extract_strided_slice %1 {offsets = [1, 1, 0], sizes = [8, 16, 4], strides = [1, 1, 1]} : vector<10x18x4xf32> to vector<8x16x4xf32>
    %11 = vector.shape_cast %10 : vector<8x16x4xf32> to vector<128x4xf32>
    %12 = vector.extract_strided_slice %1 {offsets = [1, 2, 0], sizes = [8, 16, 4], strides = [1, 1, 1]} : vector<10x18x4xf32> to vector<8x16x4xf32>
    %13 = vector.shape_cast %12 : vector<8x16x4xf32> to vector<128x4xf32>
    %14 = vector.extract_strided_slice %1 {offsets = [2, 0, 0], sizes = [8, 16, 4], strides = [1, 1, 1]} : vector<10x18x4xf32> to vector<8x16x4xf32>
    %15 = vector.shape_cast %14 : vector<8x16x4xf32> to vector<128x4xf32>
    %16 = vector.extract_strided_slice %1 {offsets = [2, 1, 0], sizes = [8, 16, 4], strides = [1, 1, 1]} : vector<10x18x4xf32> to vector<8x16x4xf32>
    %17 = vector.shape_cast %16 : vector<8x16x4xf32> to vector<128x4xf32>
    %18 = vector.extract_strided_slice %1 {offsets = [2, 2, 0], sizes = [8, 16, 4], strides = [1, 1, 1]} : vector<10x18x4xf32> to vector<8x16x4xf32>
    %19 = vector.shape_cast %18 : vector<8x16x4xf32> to vector<128x4xf32>
    %20 = tpu.concatenate %3, %5, %7, %9, %11, %13, %15, %17, %19 in 1 : vector<128x4xf32>, vector<128x4xf32>, vector<128x4xf32>, vector<128x4xf32>, vector<128x4xf32>, vector<128x4xf32>, vector<128x4xf32>, vector<128x4xf32>, vector<128x4xf32> -> vector<128x36xf32>
    %c0_4 = arith.constant 0 : index
    %c0_5 = arith.constant 0 : index
    %21 = vector.load %arg3[%c0_4, %c0_5] : memref<8x36xf32, #tpu.memory_space<vmem>>, vector<8x36xf32>
    %cst = arith.constant dense<0.000000e+00> : vector<8x128xf32>
    %22 = tpu.matmul %21, %20, %cst {dimension_numbers = #tpu.dot_dimension_numbers<[1], [1], [0], [0], [0, 0, 1, 0], [], []>} : vector<8x36xf32>, vector<128x36xf32>, vector<8x128xf32> -> vector<8x128xf32>
    %c0_6 = arith.constant 0 : index
    %c0_7 = arith.constant 0 : index
    %c0_8 = arith.constant 0 : index
    %23 = vector.load %arg4[%c0_6, %c0_7, %c0_8] : memref<1x8x128xf32, #tpu.memory_space<vmem>>, vector<1x8x128xf32>
    %24 = vector.shape_cast %23 : vector<1x8x128xf32> to vector<8x128xf32>
    %25 = vector.shape_cast %22 : vector<8x128xf32> to vector<1x8x128xf32>
    tpu.vector_store %arg4[%c0_6, %c0_7, %c0_8], %25 {strides = array<i32>} : memref<1x8x128xf32, #tpu.memory_space<vmem>>, vector<1x8x128xf32>,
    %cst_9 = arith.constant dense<0.000000e+00> : vector<8xf32>
    %26 = vector.multi_reduction <add>, %22, %cst_9 [1] : vector<8x128xf32> to vector<8xf32>
    %27 = vector.shape_cast %26 : vector<8xf32> to vector<8x1xf32>
    %cst_10 = arith.constant 7.812500e-03 : f32
    %28 = vector.broadcast %cst_10 : f32 to vector<8x1xf32>
    %29 = arith.mulf %27, %28 : vector<8x1xf32>
    %30 = vector.broadcast %29 : vector<8x1xf32> to vector<8x128xf32>
    %31 = arith.subf %22, %30 : vector<8x128xf32>
    %32 = arith.mulf %31, %31 : vector<8x128xf32>
    %cst_11 = arith.constant dense<0.000000e+00> : vector<8xf32>
    %33 = vector.multi_reduction <add>, %32, %cst_11 [1] : vector<8x128xf32> to vector<8xf32>
    %34 = vector.shape_cast %33 : vector<8xf32> to vector<8x1xf32>
    %35 = tpu.concatenate %27, %34 in 1 : vector<8x1xf32>, vector<8x1xf32> -> vector<8x2xf32>
    %c0_12 = arith.constant 0 : index
    %c0_13 = arith.constant 0 : index
    %c0_14 = arith.constant 0 : index
    %c0_15 = arith.constant 0 : index
    %36 = vector.load %arg5[%c0_12, %c0_13, %c0_14, %c0_15] : memref<1x1x8x2xf32, #tpu.memory_space<vmem>>, vector<1x1x8x2xf32>
    %37 = vector.shape_cast %36 : vector<1x1x8x2xf32> to vector<8x2xf32>
    %38 = vector.shape_cast %35 : vector<8x2xf32> to vector<1x1x8x2xf32>
    tpu.vector_store %arg5[%c0_12, %c0_13, %c0_14, %c0_15], %38 {strides = array<i32>} : memref<1x1x8x2xf32, #tpu.memory_space<vmem>>, vector<1x1x8x2xf32>,
    return
  }
  func.func @transform_0(%arg0: i32, %arg1: i32) -> (i32, i32, i32, i32, i32) {
    %c0_i32 = arith.constant 0 : i32
    %c0_i32_0 = arith.constant 0 : i32
    %c0_i32_1 = arith.constant 0 : i32
    %c0_i32_2 = arith.constant 0 : i32
    return %arg0, %arg1, %c0_i32, %c0_i32_0, %c0_i32_1 : i32, i32, i32, i32, i32
  }
  func.func @transform_1(%arg0: i32, %arg1: i32) -> (i32, i32) {
    %c0_i32 = arith.constant 0 : i32
    %c0_i32_0 = arith.constant 0 : i32
    %c0_i32_1 = arith.constant 0 : i32
    return %c0_i32, %c0_i32_0 : i32, i32
  }
  func.func @transform_2(%arg0: i32, %arg1: i32) -> (i32, i32, i32) {
    %c0_i32 = arith.constant 0 : i32
    %c0_i32_0 = arith.constant 0 : i32
    return %arg0, %c0_i32, %arg1 : i32, i32, i32
  }
  func.func @transform_3(%arg0: i32, %arg1: i32) -> (i32, i32, i32, i32) {
    %c0_i32 = arith.constant 0 : i32
    %c0_i32_0 = arith.constant 0 : i32
    %c0_i32_1 = arith.constant 0 : i32
    return %arg0, %arg1, %c0_i32, %c0_i32_0 : i32, i32, i32, i32
  }
}

module attributes {stable_mosaic.version = 11 : i64} {
  func.func @bn_relu_kernel(%arg0: i32, %arg1: i32, %arg2: memref<1x8x128xf32, #tpu.memory_space<vmem>>, %arg3: memref<8x1xf32, #tpu.memory_space<vmem>>, %arg4: memref<8x1xf32, #tpu.memory_space<vmem>>, %arg5: memref<1x8x128xf32, #tpu.memory_space<vmem>>) attributes {dimension_semantics = [#tpu.dimension_semantics<parallel>, #tpu.dimension_semantics<parallel>], iteration_bounds = array<i64: 2, 2>, scalar_prefetch = 0 : i64, scratch_operands = 0 : i64, tpu.core_type = #tpu.core_type<tc>, window_params = [{transform_indices = @transform_0, window_bounds = array<i64: 1, 8, 128>}, {pipeline_mode = #tpu.pipeline_mode<synchronous>, transform_indices = @transform_1, window_bounds = array<i64: 8, 1>}, {pipeline_mode = #tpu.pipeline_mode<synchronous>, transform_indices = @transform_2, window_bounds = array<i64: 8, 1>}, {transform_indices = @transform_3, window_bounds = array<i64: 1, 8, 128>}]} {
    %c0 = arith.constant 0 : index
    %c0_0 = arith.constant 0 : index
    %c0_1 = arith.constant 0 : index
    %0 = vector.load %arg2[%c0, %c0_0, %c0_1] : memref<1x8x128xf32, #tpu.memory_space<vmem>>, vector<1x8x128xf32>
    %1 = vector.shape_cast %0 : vector<1x8x128xf32> to vector<8x128xf32>
    %c0_2 = arith.constant 0 : index
    %c0_3 = arith.constant 0 : index
    %2 = vector.load %arg3[%c0_2, %c0_3] : memref<8x1xf32, #tpu.memory_space<vmem>>, vector<8x1xf32>
    %3 = vector.broadcast %2 : vector<8x1xf32> to vector<8x128xf32>
    %4 = arith.mulf %1, %3 : vector<8x128xf32>
    %c0_4 = arith.constant 0 : index
    %c0_5 = arith.constant 0 : index
    %5 = vector.load %arg4[%c0_4, %c0_5] : memref<8x1xf32, #tpu.memory_space<vmem>>, vector<8x1xf32>
    %6 = vector.broadcast %5 : vector<8x1xf32> to vector<8x128xf32>
    %7 = arith.addf %4, %6 : vector<8x128xf32>
    %cst = arith.constant 0.000000e+00 : f32
    %8 = vector.broadcast %cst : f32 to vector<8x128xf32>
    %9 = arith.maximumf %7, %8 : vector<8x128xf32>
    %c0_6 = arith.constant 0 : index
    %c0_7 = arith.constant 0 : index
    %c0_8 = arith.constant 0 : index
    %10 = vector.load %arg5[%c0_6, %c0_7, %c0_8] : memref<1x8x128xf32, #tpu.memory_space<vmem>>, vector<1x8x128xf32>
    %11 = vector.shape_cast %10 : vector<1x8x128xf32> to vector<8x128xf32>
    %12 = vector.shape_cast %9 : vector<8x128xf32> to vector<1x8x128xf32>
    tpu.vector_store %arg5[%c0_6, %c0_7, %c0_8], %12 {strides = array<i32>} : memref<1x8x128xf32, #tpu.memory_space<vmem>>, vector<1x8x128xf32>,
    return
  }
  func.func @transform_0(%arg0: i32, %arg1: i32) -> (i32, i32, i32) {
    %c0_i32 = arith.constant 0 : i32
    %c0_i32_0 = arith.constant 0 : i32
    return %arg0, %c0_i32, %arg1 : i32, i32, i32
  }
  func.func @transform_1(%arg0: i32, %arg1: i32) -> (i32, i32) {
    %c0_i32 = arith.constant 0 : i32
    %c0_i32_0 = arith.constant 0 : i32
    %c0_i32_1 = arith.constant 0 : i32
    return %c0_i32, %c0_i32_0 : i32, i32
  }
  func.func @transform_2(%arg0: i32, %arg1: i32) -> (i32, i32) {
    %c0_i32 = arith.constant 0 : i32
    %c0_i32_0 = arith.constant 0 : i32
    %c0_i32_1 = arith.constant 0 : i32
    return %c0_i32, %c0_i32_0 : i32, i32
  }
  func.func @transform_3(%arg0: i32, %arg1: i32) -> (i32, i32, i32) {
    %c0_i32 = arith.constant 0 : i32
    %c0_i32_0 = arith.constant 0 : i32
    return %arg0, %c0_i32, %arg1 : i32, i32, i32
  }
}

</mosaic_0001>

<bundles_post_ra>
// kernel: conv_bn_relu.3
= control target key start
LH: loop header
LB: loop body
LE: loop exit
PB: predicated region body
PF: predicated region fallthrough
CT: control target
= control target key end

     0   :  { %s419_s12 = smov 0   ;;  %s421_s13 = smov 0   ;;  %s476_s0 = inlined_call_operand.vmem [shape: f32[2,8,256], index: 0, kind: input, shape index: {}, may-alias: {0,3}]   ;;  %s477_s1 = inlined_call_operand.vmem [shape: f32[8,1], index: 1, kind: input, shape index: {}]   ;;  %s478_s2 = inlined_call_operand.vmem [shape: f32[8,1], index: 2, kind: input, shape index: {}]   ;;  %s479_s3 = inlined_call_operand.vmem [shape: f32[2,8,256], index: 3, kind: output, shape index: {}, may-alias: {0,3}]  }
   0x1   :  { %s423_s14 = smov 0   ;;  %s425_s15 = smov 0  }
   0x2   :  { %s427_s16 = smov 0  }
   0x3 LB: > { %s22_s17 = sadd.s32 1, %s388_s14  ;;  %s25_s18 = sadd.s32 1, %s392_s15  ;;  %s396_s16 = sphi %s427_s16, %s13_s16   ;;  %s392_s15 = sphi %s425_s15, %s483_s15   ;;  %s388_s14 = sphi %s423_s14, %s482_s14   ;;  %s384_s13 = sphi %s421_s13, %s481_s13   ;;  %s380_s12 = sphi %s419_s12, %s480_s12  }
   0x4   : > { %p23_p0 = scmp.ge.s32.totalorder %s22_s17, 2  ;;  %p309_p1 = scmp.ge.s32.totalorder %s396_s16, 1 }
   0x5   : > { %p156_p2 = scmp.lt.s32.totalorder %s396_s16, 5 }
   0x6   : > { %s485_s17 = smov (%p23_p0, %s22_s17), 0  ;;  %s487_s18 = smov (!%p23_p0, %s25_s18), %s392_s15 }
   0x7   : > { %p157_p3 = pnand %p309_p1, %p156_p2  ;;  %p27_p4 = scmp.ge.s32.totalorder %s487_s18, 2 }
   0x8   : > { %p186_p5 = scmp.lt.s32.totalorder (!%p157_p3), %s384_s13, 1  ;;  %p188_p6 = scmp.lt.s32.totalorder (!%p157_p3), %s380_s12, 1 }
   0x9   : > { %s489_s18 = smov (%p27_p4, %s487_s18), 0  ;;  %160 = sbr.rel (%p157_p3) target bundleno = 149 (0x95), region = 32 }
   0xe   : > { %v203_v0 = vld [vmem:[%s477_s1] sm:$0xff]  ;;  %v398_v1 = vmov 0   ;;  %s491_s13 = smov (!%p186_p5, %s384_s13), 1  ;;  %s493_s12 = smov (!%p188_p6, %s380_s12), 1 }
   0xf   : > { %357 = vset.pattern.permute.xlu0 %v398_v1  ;;  %v210_v2 = vld [vmem:[%s478_s2] sm:$0xff]  ;;  %s310_s23 = sshll.u32 %s491_s13, 1 }
  0x10   : > { %206 = vperm.xlu0 %357, %v203_v0   ;;  %s191_s24 = sadd.s32 %s310_s23, %s493_s12 }
  0x11   : > { %s311_s25 = sshll.u32 %s191_s24, 3 }
  0x12   : > { %s193_s28 = scalar_lea.vmem %s476_s0, %s311_s25  ;;  %s201_s4 = scalar_lea.vmem %s479_s3, %s311_s25 }
  0x13   : > { %v202_v4 = vld [vmem:[%s193_s28] sm:$0xff] }
  0x14   : > { %213 = vperm.xlu0 %357, %v210_v2  }
  0x8b   : > { %v207_v3 = vpop.permute.xlu0 %206 }
  0x8c   : > { %v209_v5 = vmul.f32 %v207_v3, %v202_v4 }
  0x8f   : > { %v214_v6 = vpop.permute.xlu0 %213 }
  0x90   : > { %v216_v7 = vadd.f32 %v214_v6, %v209_v5 }
  0x92   : > { %v217_v8 = vmax.f32 %v216_v7, 0.0 }
  0x94   : > { %218 = vst [vmem:[%s201_s4] sm:$0xff] %v217_v8 }
  0x95 PF: > { %s13_s16 = sadd.s32 1, %s396_s16   ;;  %s480_s12 = smov %s388_s14 }
  0x96   : > { %p10_p7 = scmp.ge.s32.totalorder %s13_s16, 6   ;;  %s481_s13 = smov %s392_s15 }
  0x97   : > { %s482_s14 = smov %s485_s17  ;;  %s483_s15 = smov %s489_s18 }
  0x98   :  { %12 = sbr.rel (!%p10_p7) target bundleno = 3 (0x3), region = 62 }

// kernel: conv_bn_relu.2
= control target key start
LH: loop header
LB: loop body
LE: loop exit
PB: predicated region body
PF: predicated region fallthrough
CT: control target
= control target key end

     0   :  { %s1382_s12 = smov 0   ;;  %s1384_s13 = smov 0   ;;  %s2066_s0 = inlined_call_operand.vmem [shape: f32[2,2,10,18,4], index: 0, kind: input, shape index: {}]   ;;  %s2067_s1 = inlined_call_operand.vmem [shape: f32[8,36], index: 1, kind: input, shape index: {}]   ;;  %s2068_s2 = inlined_call_operand.vmem [shape: f32[2,8,256], index: 2, kind: output, shape index: {0}]   ;;  %s2069_s3 = inlined_call_operand.vmem [shape: f32[2,2,8,2], index: 3, kind: output, shape index: {1}]  }
   0x1   :  { %s1386_s14 = smov 0   ;;  %s1388_s15 = smov 0  }
   0x2   :  { %s1390_s16 = smov 0  }
   0x3 LB: > { %s23_s17 = sadd.s32 1, %s1342_s14  ;;  %s26_s18 = sadd.s32 1, %s1346_s15  ;;  %s1350_s16 = sphi %s1390_s16, %s14_s16   ;;  %s1346_s15 = sphi %s1388_s15, %s2073_s15   ;;  %s1342_s14 = sphi %s1386_s14, %s2072_s14   ;;  %s1338_s13 = sphi %s1384_s13, %s2071_s13   ;;  %s1334_s12 = sphi %s1382_s12, %s2070_s12  }
   0x4   : > { %p24_p0 = scmp.ge.s32.totalorder %s23_s17, 2  ;;  %p1183_p1 = scmp.ge.s32.totalorder %s1350_s16, 1 }
   0x5   : > { %p162_p2 = scmp.lt.s32.totalorder %s1350_s16, 5 }
   0x6   : > { %s2075_s17 = smov (%p24_p0, %s23_s17), 0  ;;  %s2077_s18 = smov (!%p24_p0, %s26_s18), %s1346_s15 }
   0x7   : > { %p163_p3 = pnand %p1183_p1, %p162_p2  ;;  %p28_p4 = scmp.ge.s32.totalorder %s2077_s18, 2 }
   0x8   : > { %p201_p5 = scmp.lt.s32.totalorder (!%p163_p3), %s1338_s13, 1  ;;  %p203_p6 = scmp.lt.s32.totalorder (!%p163_p3), %s1334_s12, 1 }
   0x9   : > { %s2079_s18 = smov (%p28_p4, %s2077_s18), 0  ;;  %166 = sbr.rel (%p163_p3) target bundleno = 874 (0x36a), region = 28 }
   0xa   : > { %s1352_s26 = smov (!%p163_p3), 12   ;;  %s1353_s27 = smov (!%p163_p3), 4  }
   0xb   : > { %s1354_s28 = smov (!%p163_p3), 24   ;;  %s1355_s29 = smov (!%p163_p3), 8  }
   0xc   : > { %s1356_s30 = smov (!%p163_p3), 16   ;;  %s1357_s4 = smov (!%p163_p3), 20  }
   0xd   : > { %s1358_s5 = smov (!%p163_p3), 28   ;;  %s1360_s6 = smov (!%p163_p3), 32  }
   0xe   : > { %s2081_s13 = smov (!%p201_p5, %s1338_s13), 1  ;;  %s2083_s12 = smov (!%p203_p6, %s1334_s12), 1  ;;  %vm280_vm0 = vcmask 1046528   ;;  %vm321_vm1 = vcmask 1045504   ;;  %v1359_v34 = vmov 0.0   ;;  %vm772_vm2 = vcmask 31744  }
   0xf   : > { %s1261_s19 = smul.u32 60, %s2081_s13  ;;  %1225 = vmatprep.subr.mxu0 %v1359_v34  ;;  %vm789_vm3 = vcmask 64512   ;;  %vm806_vm4 = vcmask 97280   ;;  %vm823_vm5 = vcmask 130048   ;;  %vm840_vm6 = vcmask 162816   ;;  %s1185_s9 = sshll.u32 %s2081_s13, 1 }
  0x10   : > { %s1260_s20 = smul.u32 30, %s2083_s12  ;;  %vm857_vm7 = vcmask 195584   ;;  %vm874_vm8 = vcmask 228352   ;;  %vm891_vm9 = vcmask 261120   ;;  %vm909_vm10 = vcmask 293888   ;;  %s215_s10 = sadd.s32 %s1185_s9, %s2083_s12 }
  0x11   : > { %vm1361_vm11 = vmmov 0   ;;  %s1186_s11 = sshll.u32 %s215_s10, 3  ;;  %vm1039_vm12 = vcmask 7168   ;;  %vm1041_vm13 = vcmask 15360  }
  0x12   : > { %s207_s21 = sadd.s32 %s1261_s19, %s1260_s20  ;;  %1257 = vmatprep.mubr.msk.f32.mxu0 %vm1361_vm11, %v1359_v34  ;;  %s225_s13 = scalar_lea.vmem %s2069_s3, %s1186_s11 }
  0x13   : > { %s1184_s22 = sshll.u32 %s207_s21, 3  ;;  %s217_s21 = scalar_lea.vmem %s2068_s2, %s1186_s11 }
  0x14   : > { %s1421_s25 = scalar_lea.vmem %s2066_s0, %s1184_s22 }
  0x15   : > { %v1424_v0 = vld [vmem:[%s1421_s25 + $0xc8] sm:$0xff]  ;;  %v1427_v1 = vld [vmem:[%s1421_s25 + $0xb0] sm:$0xff]  ;;  %v249_v2 = vld [vmem:[%s1421_s25 + $0xb8] sm:$0x3] }
  0x16   : > { %514 = vrot.lane.b32.xlu1 %v1424_v0, %s1352_s26  ;;  %v317_v3 = vrot.slane %v1427_v1, 1  ;;  %v319_v4 = vrot.slane %v249_v2, 1  ;;  %v358_v5 = vrot.slane %v1427_v1, 2  ;;  %v360_v6 = vrot.slane %v249_v2, 2  ;;  %v1435_v7 = vld [vmem:[%s1421_s25 + $0xe0] sm:$0xff]  ;;  %v1440_v10 = vld [vmem:[%s1421_s25 + $0xa8] sm:$0xff] }
  0x17   : > { %v252_v8 = vld [vmem:[%s1421_s25 + $0xd0] sm:$0x3]  ;;  %v366_v9 = vrot.slane %v1424_v0, 1  ;;  %v316_v14 = vrot.slane %v1440_v10, 1  ;;  %v371_v16 = vrot.slane %v1424_v0, 2  ;;  %v357_v20 = vrot.slane %v1440_v10, 2 }
  0x18   : > { %v1443_v11 = vsel %vm280_vm0, %v317_v3, %v319_v4  ;;  %v368_v12 = vrot.slane %v252_v8, 1  ;;  %v1450_v13 = vsel %vm321_vm1, %v358_v5, %v360_v6  ;;  %v373_v17 = vrot.slane %v252_v8, 2  ;;  %v255_v18 = vld [vmem:[%s1421_s25 + $0xe8] sm:$0x3]  ;;  %v250_v27 = vld [vmem:[%s1421_s25 + $0xc0] sm:$0xff]  ;;  %v1482_v32 = vld [vmem:[%s1421_s25 + $0x98] sm:$0xff] }
  0x19   : > { %418 = vrot.lane.b32.xlu0 %v1443_v11, %s1353_s27  ;;  %v1463_v19 = vsel %vm280_vm0, %v316_v14, %v317_v3  ;;  %v379_v21 = vrot.slane %v1435_v7, 1  ;;  %v381_v23 = vrot.slane %v255_v18, 1  ;;  %v1472_v24 = vsel %vm321_vm1, %v357_v20, %v358_v5  ;;  %v246_v33 = vld [vmem:[%s1421_s25 + $0xa0] sm:$0x3]  ;;  %v253_v39 = vld [vmem:[%s1421_s25 + $0xd8] sm:$0xff]  ;;  %v1510_v48 = vld [vmem:[%s1421_s25 + $0x90] sm:$0xff] }
  0x1a   : > { %658 = vrot.lane.b32.xlu1 %v1435_v7, %s1354_s28  ;;  %v1454_v15 = vsel %vm280_vm0, %v366_v9, %v368_v12  ;;  %v374_v22 = vsel %vm321_vm1, %v371_v16, %v373_v17  ;;  %v384_v25 = vrot.slane %v1435_v7, 2  ;;  %v386_v28 = vrot.slane %v255_v18, 2  ;;  %v1536_v53 = vld [vmem:[%s1421_s25 + $0x80] sm:$0xff]  ;;  %v243_v54 = vld [vmem:[%s1421_s25 + $0x88] sm:$0x3]  ;;  %v1561_v61 = vld [vmem:[%s1421_s25 + $0x78] sm:$0xff] }
  0x1b   : > { %v382_v26 = vsel %vm280_vm0, %v379_v21, %v381_v23  ;;  %v365_v29 = vrot.slane %v250_v27, 1  ;;  %v370_v31 = vrot.slane %v250_v27, 2  ;;  %v312_v36 = vrot.slane %v1482_v32, 1  ;;  %v1587_v3 = vld [vmem:[%s1421_s25 + $0x68] sm:$0xff]  ;;  %v240_v4 = vld [vmem:[%s1421_s25 + $0x70] sm:$0x3] }
  0x1c   : > { %v387_v30 = vsel %vm321_vm1, %v384_v25, %v386_v28  ;;  %v314_v37 = vrot.slane %v246_v33, 1  ;;  %v353_v41 = vrot.slane %v1482_v32, 2  ;;  %v355_v42 = vrot.slane %v246_v33, 2  ;;  %v1615_v12 = vld [vmem:[%s1421_s25 + $0x60] sm:$0xff]  ;;  %v1642_v17 = vld [vmem:[%s1421_s25 + $0x50] sm:$0xff] }
  0x1d   : > { %466 = vrot.lane.b32.xlu0 %v1450_v13, %s1355_s29  ;;  %v367_v35 = vsel %vm280_vm0, %v365_v29, %v366_v9  ;;  %v372_v38 = vsel %vm321_vm1, %v370_v31, %v371_v16  ;;  %v378_v43 = vrot.slane %v253_v39, 1  ;;  %v383_v45 = vrot.slane %v253_v39, 2  ;;  %v237_v18 = vld [vmem:[%s1421_s25 + $0x58] sm:$0x3] }
  0x1e   : > { %562 = vrot.lane.b32.xlu1 %v1454_v15, %s1356_s30  ;;  %v1495_v40 = vsel %vm280_vm0, %v312_v36, %v314_v37  ;;  %v1502_v44 = vsel %vm321_vm1, %v353_v41, %v355_v42  ;;  %v311_v49 = vrot.slane %v1510_v48, 1  ;;  %v352_v51 = vrot.slane %v1510_v48, 2 }
  0x1f   : > { %v380_v46 = vsel %vm280_vm0, %v378_v43, %v379_v21  ;;  %v385_v47 = vsel %vm321_vm1, %v383_v45, %v384_v25  ;;  %v307_v55 = vrot.slane %v1536_v53, 1  ;;  %v309_v56 = vrot.slane %v243_v54, 1 }
  0x20   : > { %v1521_v50 = vsel %vm280_vm0, %v311_v49, %v312_v36  ;;  %v1529_v52 = vsel %vm321_vm1, %v352_v51, %v353_v41  ;;  %v348_v58 = vrot.slane %v1536_v53, 2  ;;  %v350_v59 = vrot.slane %v243_v54, 2 }
  0x21   : > { %416 = vrot.lane.b32.xlu0 %v1463_v19, %s1353_s27  ;;  %v1548_v57 = vsel %vm280_vm0, %v307_v55, %v309_v56  ;;  %v306_v62 = vrot.slane %v1561_v61, 1  ;;  %v302_v5 = vrot.slane %v1587_v3, 1  ;;  %v304_v6 = vrot.slane %v240_v4, 1 }
  0x22   : > { %610 = vrot.lane.b32.xlu1 %v374_v22, %s1357_s4  ;;  %v1555_v60 = vsel %vm321_vm1, %v348_v58, %v350_v59  ;;  %v343_v8 = vrot.slane %v1587_v3, 2  ;;  %v345_v9 = vrot.slane %v240_v4, 2  ;;  %v297_v20 = vrot.slane %v1642_v17, 1  ;;  %v1713_v4 = vld [vmem:[%s1421_s25 + $0x38] sm:$0xff] }
  0x23   : > { %v1572_v63 = vsel %vm280_vm0, %v306_v62, %v307_v55  ;;  %v1600_v7 = vsel %vm280_vm0, %v302_v5, %v304_v6  ;;  %v299_v21 = vrot.slane %v237_v18, 1  ;;  %v338_v25 = vrot.slane %v1642_v17, 2 }
  0x25   : > { %464 = vrot.lane.b32.xlu0 %v1472_v24, %s1355_s29 }
  0x26   : > { %706 = vrot.lane.b32.xlu1 %v382_v26, %s1358_s5  ;;  %v340_v26 = vrot.slane %v237_v18, 2 }
  0x28   : > { %v1666_v31 = vsel %vm321_vm1, %v338_v25, %v340_v26 }
  0x29   : > { %512 = vrot.lane.b32.xlu0 %v250_v27, %s1352_s26 }
  0x2a   : > { %754 = vrot.lane.b32.xlu1 %v387_v30, %s1360_s6 }
  0x2d   : > { %560 = vrot.lane.b32.xlu0 %v367_v35, %s1356_s30 }
  0x2e   : > { %608 = vrot.lane.b32.xlu1 %v372_v38, %s1357_s4 }
  0x31   : > { %414 = vrot.lane.b32.xlu0 %v1495_v40, %s1353_s27 }
  0x32   : > { %656 = vrot.lane.b32.xlu1 %v253_v39, %s1354_s28 }
  0x35   : > { %462 = vrot.lane.b32.xlu0 %v1502_v44, %s1355_s29 }
  0x36   : > { %704 = vrot.lane.b32.xlu1 %v380_v46, %s1358_s5 }
  0x39   : > { %510 = vrot.lane.b32.xlu0 %v1427_v1, %s1352_s26 }
  0x3a   : > { %752 = vrot.lane.b32.xlu1 %v385_v47, %s1360_s6 }
  0x3d   : > { %558 = vrot.lane.b32.xlu0 %v1443_v11, %s1356_s30 }
  0x3e   : > { %606 = vrot.lane.b32.xlu1 %v1450_v13, %s1357_s4 }
  0x41   : > { %412 = vrot.lane.b32.xlu0 %v1521_v50, %s1353_s27 }
  0x42   : > { %654 = vrot.lane.b32.xlu1 %v1424_v0, %s1354_s28  ;;  %v347_v0 = vrot.slane %v1561_v61, 2 }
  0x44   : > { %v1580_v2 = vsel %vm321_vm1, %v347_v0, %v348_v58 }
  0x45   : > { %460 = vrot.lane.b32.xlu0 %v1529_v52, %s1355_s29 }
  0x46   : > { %702 = vrot.lane.b32.xlu1 %v1454_v15, %s1358_s5  ;;  %v342_v15 = vrot.slane %v1615_v12, 2 }
  0x48   : > { %v1635_v16 = vsel %vm321_vm1, %v342_v15, %v343_v8 }
  0x49   : > { %508 = vrot.lane.b32.xlu0 %v1440_v10, %s1352_s26 }
  0x4a   : > { %750 = vrot.lane.b32.xlu1 %v374_v22, %s1360_s6 }
  0x4d   : > { %556 = vrot.lane.b32.xlu0 %v1463_v19, %s1356_s30 }
  0x4e   : > { %604 = vrot.lane.b32.xlu1 %v1472_v24, %s1357_s4 }
  0x51   : > { %410 = vrot.lane.b32.xlu0 %v1548_v57, %s1353_s27 }
  0x52   : > { %652 = vrot.lane.b32.xlu1 %v250_v27, %s1354_s28 }
  0x55   : > { %458 = vrot.lane.b32.xlu0 %v1555_v60, %s1355_s29 }
  0x56   : > { %700 = vrot.lane.b32.xlu1 %v367_v35, %s1358_s5 }
  0x59   : > { %506 = vrot.lane.b32.xlu0 %v1482_v32, %s1352_s26 }
  0x5a   : > { %748 = vrot.lane.b32.xlu1 %v372_v38, %s1360_s6  ;;  %v1675_v38 = vld [vmem:[%s1421_s25 + $0x48] sm:$0xff] }
  0x5b   : > { %v296_v41 = vrot.slane %v1675_v38, 1  ;;  %v337_v49 = vrot.slane %v1675_v38, 2 }
  0x5d   : > { %554 = vrot.lane.b32.xlu0 %v1495_v40, %s1356_s30  ;;  %v1692_v47 = vsel %vm280_vm0, %v296_v41, %v297_v20 }
  0x5e   : > { %602 = vrot.lane.b32.xlu1 %v1502_v44, %s1357_s4 }
  0x61   : > { %408 = vrot.lane.b32.xlu0 %v1572_v63, %s1353_s27 }
  0x62   : > { %650 = vrot.lane.b32.xlu1 %v1427_v1, %s1354_s28 }
  0x65   : > { %456 = vrot.lane.b32.xlu0 %v1580_v2, %s1355_s29 }
  0x66   : > { %698 = vrot.lane.b32.xlu1 %v1443_v11, %s1358_s5  ;;  %v1608_v11 = vsel %vm321_vm1, %v343_v8, %v345_v9  ;;  %v292_v8 = vrot.slane %v1713_v4, 1 }
  0x69   : > { %504 = vrot.lane.b32.xlu0 %v1510_v48, %s1352_s26 }
  0x6a   : > { %746 = vrot.lane.b32.xlu1 %v1450_v13, %s1360_s6  ;;  %v301_v13 = vrot.slane %v1615_v12, 1 }
  0x6c   : > { %v1627_v14 = vsel %vm280_vm0, %v301_v13, %v302_v5  ;;  %v234_v5 = vld [vmem:[%s1421_s25 + $0x40] sm:$0x3] }
  0x6d   : > { %552 = vrot.lane.b32.xlu0 %v1521_v50, %s1356_s30  ;;  %v294_v9 = vrot.slane %v234_v5, 1 }
  0x6e   : > { %600 = vrot.lane.b32.xlu1 %v1529_v52, %s1357_s4 }
  0x71   : > { %406 = vrot.lane.b32.xlu0 %v1600_v7, %s1353_s27 }
  0x72   : > { %648 = vrot.lane.b32.xlu1 %v1440_v10, %s1354_s28 }
  0x75   : > { %454 = vrot.lane.b32.xlu0 %v1608_v11, %s1355_s29 }
  0x76   : > { %696 = vrot.lane.b32.xlu1 %v1463_v19, %s1358_s5 }
  0x79   : > { %502 = vrot.lane.b32.xlu0 %v1536_v53, %s1352_s26 }
  0x7a   : > { %744 = vrot.lane.b32.xlu1 %v1472_v24, %s1360_s6  ;;  %v1655_v24 = vsel %vm280_vm0, %v297_v20, %v299_v21  ;;  %v333_v20 = vrot.slane %v1713_v4, 2  ;;  %v335_v21 = vrot.slane %v234_v5, 2 }
  0x7d   : > { %550 = vrot.lane.b32.xlu0 %v1548_v57, %s1356_s30 }
  0x7e   : > { %598 = vrot.lane.b32.xlu1 %v1555_v60, %s1357_s4 }
  0x81   : > { %404 = vrot.lane.b32.xlu0 %v1627_v14, %s1353_s27 }
  0x82   : > { %646 = vrot.lane.b32.xlu1 %v1482_v32, %s1354_s28 }
  0x85   : > { %452 = vrot.lane.b32.xlu0 %v1635_v16, %s1355_s29 }
  0x86   : > { %694 = vrot.lane.b32.xlu1 %v1495_v40, %s1358_s5 }
  0x88   : > { %v515_v19 = vpop.permute.xlu1 %514 }
  0x89   : > { %500 = vrot.lane.b32.xlu0 %v1561_v61, %s1352_s26 }
  0x8a   : > { %742 = vrot.lane.b32.xlu1 %v1502_v44, %s1360_s6 }
  0x8b   : > { %v419_v22 = vpop.permute.xlu0 %418 }
  0x8c   : > { %v659_v23 = vpop.permute.xlu1 %658  ;;  %v788_v28 = vsel %vm772_vm2, %v1427_v1, %v419_v22 }
  0x8d   : > { %548 = vrot.lane.b32.xlu0 %v1572_v63, %s1356_s30 }
  0x8e   : > { %596 = vrot.lane.b32.xlu1 %v1580_v2, %s1357_s4 }
  0x8f   : > { %v467_v27 = vpop.permute.xlu0 %466 }
  0x90   : > { %v563_v29 = vpop.permute.xlu1 %562  ;;  %v805_v30 = vsel %vm789_vm3, %v788_v28, %v467_v27 }
  0x91   : > { %402 = vrot.lane.b32.xlu0 %v1655_v24, %s1353_s27  ;;  %v822_v35 = vsel %vm806_vm4, %v805_v30, %v515_v19 }
  0x92   : > { %644 = vrot.lane.b32.xlu1 %v1510_v48, %s1354_s28  ;;  %v839_v1 = vsel %vm823_vm5, %v822_v35, %v563_v29 }
  0x93   : > { %v417_v33 = vpop.permute.xlu0 %416 }
  0x94   : > { %v611_v36 = vpop.permute.xlu1 %610  ;;  %v787_v55 = vsel %vm772_vm2, %v1440_v10, %v417_v33 }
  0x95   : > { %450 = vrot.lane.b32.xlu0 %v1666_v31, %s1355_s29  ;;  %v856_v39 = vsel %vm840_vm6, %v839_v1, %v611_v36  ;;  %v1752_v36 = vld [vmem:[%s1421_s25 + $0x30] sm:$0xff] }
  0x96   : > { %692 = vrot.lane.b32.xlu1 %v1521_v50, %s1358_s5  ;;  %v873_v42 = vsel %vm857_vm7, %v856_v39, %v659_v23 }
  0x97   : > { %v465_v37 = vpop.permute.xlu0 %464 }
  0x98   : > { %v707_v40 = vpop.permute.xlu1 %706  ;;  %v804_v58 = vsel %vm789_vm3, %v787_v55, %v465_v37  ;;  %v291_v37 = vrot.slane %v1752_v36, 1 }
  0x99   : > { %498 = vrot.lane.b32.xlu0 %v1587_v3, %s1352_s26  ;;  %v890_v44 = vsel %vm874_vm8, %v873_v42, %v707_v40 }
  0x9a   : > { %740 = vrot.lane.b32.xlu1 %v1529_v52, %s1360_s6  ;;  %v1701_v52 = vsel %vm321_vm1, %v337_v49, %v338_v25  ;;  %v1740_v25 = vsel %vm321_vm1, %v333_v20, %v335_v21 }
  0x9b   : > { %v513_v43 = vpop.permute.xlu0 %512 }
  0x9c   : > { %v755_v45 = vpop.permute.xlu1 %754  ;;  %v821_v59 = vsel %vm806_vm4, %v804_v58, %v513_v43  ;;  %v332_v43 = vrot.slane %v1752_v36, 2 }
  0x9d   : > { %546 = vrot.lane.b32.xlu0 %v1600_v7, %s1356_s30  ;;  %v907_v46 = vsel %vm891_vm9, %v890_v44, %v755_v45 }
  0x9e   : > { %1226 = vmatpush3.xpose.msk.msra.mxu0 %vm909_vm10, %v907_v46  ;;  %594 = vrot.lane.b32.xlu1 %v1608_v11, %s1357_s4  ;;  %v1778_v46 = vsel %vm321_vm1, %v332_v43, %v333_v20 }
  0x9f   : > { %v561_v50 = vpop.permute.xlu0 %560  ;;  %1227 = vmatprep.subr.mxu0 %v1359_v34 }
  0xa0   : > { %v609_v51 = vpop.permute.xlu1 %608  ;;  %v838_v62 = vsel %vm823_vm5, %v821_v59, %v561_v50  ;;  %v1790_v59 = vld [vmem:[%s1421_s25 + $0x20] sm:$0xff] }
  0xa1   : > { %400 = vrot.lane.b32.xlu0 %v1692_v47, %s1353_s27  ;;  %v855_v10 = vsel %vm840_vm6, %v838_v62, %v609_v51  ;;  %v231_v62 = vld [vmem:[%s1421_s25 + $0x28] sm:$0x3]  ;;  %v287_v5 = vrot.slane %v1790_v59, 1 }
  0xa2   : > { %642 = vrot.lane.b32.xlu1 %v1536_v53, %s1354_s28 }
  0xa3   : > { %v415_v54 = vpop.permute.xlu0 %414 }
  0xa4   : > { %v657_v56 = vpop.permute.xlu1 %656  ;;  %v786_v27 = vsel %vm772_vm2, %v1482_v32, %v415_v54 }
  0xa5   : > { %448 = vrot.lane.b32.xlu0 %v1701_v52, %s1355_s29 }
  0xa6   : > { %690 = vrot.lane.b32.xlu1 %v1548_v57, %s1358_s5  ;;  %v872_v57 = vsel %vm857_vm7, %v855_v10, %v657_v56 }
  0xa7   : > { %v463_v0 = vpop.permute.xlu0 %462 }
  0xa8   : > { %v705_v6 = vpop.permute.xlu1 %704  ;;  %v803_v29 = vsel %vm789_vm3, %v786_v27, %v463_v0 }
  0xa9   : > { %496 = vrot.lane.b32.xlu0 %v1615_v12, %s1352_s26  ;;  %v889_v15 = vsel %vm874_vm8, %v872_v57, %v705_v6  ;;  %v289_v6 = vrot.slane %v231_v62, 1 }
  0xaa   : > { %738 = vrot.lane.b32.xlu1 %v1555_v60, %s1360_s6  ;;  %v1731_v60 = vsel %vm280_vm0, %v292_v8, %v294_v9 }
  0xab   : > { %v511_v13 = vpop.permute.xlu0 %510 }
  0xac   : > { %v753_v18 = vpop.permute.xlu1 %752  ;;  %v820_v30 = vsel %vm806_vm4, %v803_v29, %v511_v13  ;;  %v328_v13 = vrot.slane %v1790_v59, 2 }
  0xad   : > { %v906_v19 = vsel %vm891_vm9, %v889_v15, %v753_v18  ;;  %544 = vrot.lane.b32.xlu0 %v1627_v14, %s1356_s30  ;;  %v330_v15 = vrot.slane %v231_v62, 2 }
  0xae   : > { %1228 = vmatpush3.xpose.msk.msra.mxu0 %vm909_vm10, %v906_v19  ;;  %592 = vrot.lane.b32.xlu1 %v1635_v16, %s1357_s4 }
  0xaf   : > { %v559_v22 = vpop.permute.xlu0 %558  ;;  %1229 = vmatprep.subr.mxu0 %v1359_v34  ;;  %v1817_v20 = vsel %vm321_vm1, %v328_v13, %v330_v15 }
  0xb0   : > { %v607_v23 = vpop.permute.xlu1 %606  ;;  %v837_v33 = vsel %vm823_vm5, %v820_v30, %v559_v22  ;;  %v1829_v30 = vld [vmem:[%s1421_s25 + $0x18] sm:$0xff] }
  0xb1   : > { %398 = vrot.lane.b32.xlu0 %v1731_v60, %s1353_s27  ;;  %v854_v32 = vsel %vm840_vm6, %v837_v33, %v607_v23 }
  0xb2   : > { %640 = vrot.lane.b32.xlu1 %v1561_v61, %s1354_s28 }
  0xb3   : > { %v413_v26 = vpop.permute.xlu0 %412 }
  0xb4   : > { %v655_v28 = vpop.permute.xlu1 %654  ;;  %v785_v50 = vsel %vm772_vm2, %v1510_v48, %v413_v26 }
  0xb5   : > { %446 = vrot.lane.b32.xlu0 %v1740_v25, %s1355_s29  ;;  %v871_v39 = vsel %vm857_vm7, %v854_v32, %v655_v28 }
  0xb6   : > { %688 = vrot.lane.b32.xlu1 %v1572_v63, %s1358_s5 }
  0xb7   : > { %v461_v35 = vpop.permute.xlu0 %460 }
  0xb8   : > { %v703_v1 = vpop.permute.xlu1 %702  ;;  %v802_v54 = vsel %vm789_vm3, %v785_v50, %v461_v35  ;;  %v286_v35 = vrot.slane %v1829_v30, 1 }
  0xb9   : > { %494 = vrot.lane.b32.xlu0 %v1642_v17, %s1352_s26  ;;  %v888_v63 = vsel %vm874_vm8, %v871_v39, %v703_v1 }
  0xba   : > { %736 = vrot.lane.b32.xlu1 %v1580_v2, %s1360_s6  ;;  %v1769_v2 = vsel %vm280_vm0, %v291_v37, %v292_v8 }
  0xbb   : > { %v509_v40 = vpop.permute.xlu0 %508 }
  0xbc   : > { %v751_v41 = vpop.permute.xlu1 %750  ;;  %v819_v55 = vsel %vm806_vm4, %v802_v54, %v509_v40  ;;  %v327_v40 = vrot.slane %v1829_v30, 2 }
  0xbd   : > { %v905_v42 = vsel %vm891_vm9, %v888_v63, %v751_v41  ;;  %542 = vrot.lane.b32.xlu0 %v1655_v24, %s1356_s30 }
  0xbe   : > { %1230 = vmatpush3.xpose.msk.msra.mxu0 %vm909_vm10, %v905_v42  ;;  %590 = vrot.lane.b32.xlu1 %v1666_v31, %s1357_s4  ;;  %v1855_v42 = vsel %vm321_vm1, %v327_v40, %v328_v13 }
  0xbf   : > { %v557_v44 = vpop.permute.xlu0 %556  ;;  %1231 = vmatprep.subr.mxu0 %v1359_v34 }
  0xc0   : > { %v605_v45 = vpop.permute.xlu1 %604  ;;  %v836_v56 = vsel %vm823_vm5, %v819_v55, %v557_v44  ;;  %v1867_v55 = vld [vmem:[%s1421_s25 + $0x8] sm:$0xff] }
  0xc1   : > { %396 = vrot.lane.b32.xlu0 %v1769_v2, %s1353_s27  ;;  %v853_v48 = vsel %vm840_vm6, %v836_v56, %v605_v45  ;;  %v228_v56 = vld [vmem:[%s1421_s25 + $0x10] sm:$0x3]  ;;  %v282_v62 = vrot.slane %v1867_v55, 1 }
  0xc2   : > { %638 = vrot.lane.b32.xlu1 %v1587_v3, %s1354_s28 }
  0xc3   : > { %v411_v49 = vpop.permute.xlu0 %410 }
  0xc4   : > { %v653_v51 = vpop.permute.xlu1 %652  ;;  %v784_v22 = vsel %vm772_vm2, %v1536_v53, %v411_v49 }
  0xc5   : > { %444 = vrot.lane.b32.xlu0 %v1778_v46, %s1355_s29 }
  0xc6   : > { %686 = vrot.lane.b32.xlu1 %v1600_v7, %s1358_s5  ;;  %v870_v7 = vsel %vm857_vm7, %v853_v48, %v653_v51 }
  0xc7   : > { %v459_v58 = vpop.permute.xlu0 %458 }
  0xc8   : > { %v701_v0 = vpop.permute.xlu1 %700  ;;  %v801_v26 = vsel %vm789_vm3, %v784_v22, %v459_v58 }
  0xc9   : > { %492 = vrot.lane.b32.xlu0 %v1675_v38, %s1352_s26  ;;  %v887_v8 = vsel %vm874_vm8, %v870_v7, %v701_v0  ;;  %v284_v0 = vrot.slane %v228_v56, 1 }
  0xca   : > { %734 = vrot.lane.b32.xlu1 %v1608_v11, %s1360_s6  ;;  %v1808_v11 = vsel %vm280_vm0, %v287_v5, %v289_v6 }
  0xcb   : > { %v507_v10 = vpop.permute.xlu0 %506 }
  0xcc   : > { %v749_v9 = vpop.permute.xlu1 %748  ;;  %v818_v27 = vsel %vm806_vm4, %v801_v26, %v507_v10  ;;  %v323_v10 = vrot.slane %v1867_v55, 2 }
  0xcd   : > { %v904_v57 = vsel %vm891_vm9, %v887_v8, %v749_v9  ;;  %540 = vrot.lane.b32.xlu0 %v1692_v47, %s1356_s30  ;;  %v325_v8 = vrot.slane %v228_v56, 2 }
  0xce   : > { %1232 = vmatpush3.xpose.msk.msra.mxu0 %vm909_vm10, %v904_v57  ;;  %588 = vrot.lane.b32.xlu1 %v1701_v52, %s1357_s4 }
  0xcf   : > { %v555_v18 = vpop.permute.xlu0 %554  ;;  %1233 = vmatprep.subr.mxu0 %v1359_v34  ;;  %v326_v13 = vsel %vm321_vm1, %v323_v10, %v325_v8 }
  0xd0   : > { %v603_v19 = vpop.permute.xlu1 %602  ;;  %v835_v28 = vsel %vm823_vm5, %v818_v27, %v555_v18  ;;  %v1900_v27 = vld [vmem:[%s1421_s25] sm:$0xff] }
  0xd1   : > { %394 = vrot.lane.b32.xlu0 %v1808_v11, %s1353_s27  ;;  %v852_v53 = vsel %vm840_vm6, %v835_v28, %v603_v19 }
  0xd2   : > { %636 = vrot.lane.b32.xlu1 %v1615_v12, %s1354_s28 }
  0xd3   : > { %v409_v21 = vpop.permute.xlu0 %408 }
  0xd4   : > { %v651_v23 = vpop.permute.xlu1 %650  ;;  %v783_v44 = vsel %vm772_vm2, %v1561_v61, %v409_v21 }
  0xd5   : > { %442 = vrot.lane.b32.xlu0 %v1817_v20, %s1355_s29  ;;  %v869_v1 = vsel %vm857_vm7, %v852_v53, %v651_v23 }
  0xd6   : > { %684 = vrot.lane.b32.xlu1 %v1627_v14, %s1358_s5 }
  0xd7   : > { %v457_v29 = vpop.permute.xlu0 %456 }
  0xd8   : > { %v699_v33 = vpop.permute.xlu1 %698  ;;  %v800_v49 = vsel %vm789_vm3, %v783_v44, %v457_v29  ;;  %v281_v29 = vrot.slane %v1900_v27, 1 }
  0xd9   : > { %490 = vrot.lane.b32.xlu0 %v1713_v4, %s1352_s26  ;;  %v886_v14 = vsel %vm874_vm8, %v869_v1, %v699_v33 }
  0xda   : > { %732 = vrot.lane.b32.xlu1 %v1635_v16, %s1360_s6  ;;  %v1846_v16 = vsel %vm280_vm0, %v286_v35, %v287_v5 }
  0xdb   : > { %v505_v32 = vpop.permute.xlu0 %504 }
  0xdc   : > { %v747_v37 = vpop.permute.xlu1 %746  ;;  %v817_v50 = vsel %vm806_vm4, %v800_v49, %v505_v32  ;;  %v322_v32 = vrot.slane %v1900_v27, 2 }
  0xdd   : > { %v903_v39 = vsel %vm891_vm9, %v886_v14, %v747_v37  ;;  %538 = vrot.lane.b32.xlu0 %v1731_v60, %s1356_s30 }
  0xde   : > { %1234 = vmatpush3.xpose.msk.msra.mxu0 %vm909_vm10, %v903_v39  ;;  %586 = vrot.lane.b32.xlu1 %v1740_v25, %s1357_s4 }
  0xdf   : > { %v553_v63 = vpop.permute.xlu0 %552  ;;  %1235 = vmatprep.subr.mxu0 %v1359_v34 }
  0xe0   : > { %v601_v41 = vpop.permute.xlu1 %600  ;;  %v834_v51 = vsel %vm823_vm5, %v817_v50, %v553_v63 }
  0xe1   : > { %392 = vrot.lane.b32.xlu0 %v1846_v16, %s1353_s27  ;;  %v851_v61 = vsel %vm840_vm6, %v834_v51, %v601_v41 }
  0xe2   : > { %634 = vrot.lane.b32.xlu1 %v1642_v17, %s1354_s28 }
  0xe3   : > { %v407_v43 = vpop.permute.xlu0 %406 }
  0xe4   : > { %v649_v45 = vpop.permute.xlu1 %648  ;;  %v782_v18 = vsel %vm772_vm2, %v1587_v3, %v407_v43 }
  0xe5   : > { %440 = vrot.lane.b32.xlu0 %v1855_v42, %s1355_s29 }
  0xe6   : > { %682 = vrot.lane.b32.xlu1 %v1655_v24, %s1358_s5  ;;  %v868_v24 = vsel %vm857_vm7, %v851_v61, %v649_v45 }
  0xe7   : > { %v455_v54 = vpop.permute.xlu0 %454 }
  0xe8   : > { %v697_v58 = vpop.permute.xlu1 %696  ;;  %v799_v21 = vsel %vm789_vm3, %v782_v18, %v455_v54 }
  0xe9   : > { %488 = vrot.lane.b32.xlu0 %v1752_v36, %s1352_s26  ;;  %v885_v5 = vsel %vm874_vm8, %v868_v24, %v697_v58 }
  0xea   : > { %730 = vrot.lane.b32.xlu1 %v1666_v31, %s1360_s6  ;;  %v285_v31 = vsel %vm280_vm0, %v282_v62, %v284_v0 }
  0xeb   : > { %v503_v48 = vpop.permute.xlu0 %502 }
  0xec   : > { %v745_v6 = vpop.permute.xlu1 %744  ;;  %v816_v22 = vsel %vm806_vm4, %v799_v21, %v503_v48 }
  0xed   : > { %v902_v7 = vsel %vm891_vm9, %v885_v5, %v745_v6  ;;  %536 = vrot.lane.b32.xlu0 %v1769_v2, %s1356_s30 }
  0xee   : > { %1236 = vmatpush3.xpose.msk.msra.mxu0 %vm909_vm10, %v902_v7  ;;  %584 = vrot.lane.b32.xlu1 %v1778_v46, %s1357_s4 }
  0xef   : > { %v551_v9 = vpop.permute.xlu0 %550  ;;  %1237 = vmatprep.subr.mxu0 %v1359_v34 }
  0xf0   : > { %v599_v57 = vpop.permute.xlu1 %598  ;;  %v833_v23 = vsel %vm823_vm5, %v816_v22, %v551_v9 }
  0xf1   : > { %390 = vrot.lane.b32.xlu0 %v285_v31, %s1353_s27  ;;  %v850_v3 = vsel %vm840_vm6, %v833_v23, %v599_v57 }
  0xf2   : > { %632 = vrot.lane.b32.xlu1 %v1675_v38, %s1354_s28 }
  0xf3   : > { %v405_v15 = vpop.permute.xlu0 %404 }
  0xf4   : > { %v647_v19 = vpop.permute.xlu1 %646  ;;  %v781_v40 = vsel %vm772_vm2, %v1615_v12, %v405_v15 }
  0xf5   : > { %438 = vrot.lane.b32.xlu0 %v326_v13, %s1355_s29  ;;  %v867_v33 = vsel %vm857_vm7, %v850_v3, %v647_v19 }
  0xf6   : > { %680 = vrot.lane.b32.xlu1 %v1692_v47, %s1358_s5 }
  0xf7   : > { %v453_v26 = vpop.permute.xlu0 %452 }
  0xf8   : > { %v695_v28 = vpop.permute.xlu1 %694  ;;  %v798_v63 = vsel %vm789_vm3, %v781_v40, %v453_v26 }
  0xf9   : > { %486 = vrot.lane.b32.xlu0 %v1790_v59, %s1352_s26  ;;  %v884_v47 = vsel %vm874_vm8, %v867_v33, %v695_v28 }
  0xfa   : > { %728 = vrot.lane.b32.xlu1 %v1701_v52, %s1360_s6  ;;  %v283_v52 = vsel %vm280_vm0, %v281_v29, %v282_v62 }
  0xfb   : > { %v501_v53 = vpop.permute.xlu0 %500 }
  0xfc   : > { %v743_v35 = vpop.permute.xlu1 %742  ;;  %v815_v41 = vsel %vm806_vm4, %v798_v63, %v501_v53 }
  0xfd   : > { %v901_v1 = vsel %vm891_vm9, %v884_v47, %v743_v35  ;;  %534 = vrot.lane.b32.xlu0 %v1808_v11, %s1356_s30  ;;  %v324_v11 = vsel %vm321_vm1, %v322_v32, %v323_v10 }
  0xfe   : > { %1238 = vmatpush3.xpose.msk.msra.mxu0 %vm909_vm10, %v901_v1  ;;  %582 = vrot.lane.b32.xlu1 %v1817_v20, %s1357_s4 }
  0xff   : > { %v549_v14 = vpop.permute.xlu0 %548  ;;  %1239 = vmatprep.subr.mxu0 %v1359_v34 }
 0x100   : > { %v597_v37 = vpop.permute.xlu1 %596  ;;  %v832_v43 = vsel %vm823_vm5, %v815_v41, %v549_v14 }
 0x101   : > { %388 = vrot.lane.b32.xlu0 %v283_v52, %s1353_s27  ;;  %v849_v49 = vsel %vm840_vm6, %v832_v43, %v597_v37 }
 0x102   : > { %630 = vrot.lane.b32.xlu1 %v1713_v4, %s1354_s28 }
 0x103   : > { %v403_v39 = vpop.permute.xlu0 %402 }
 0x104   : > { %v645_v20 = vpop.permute.xlu1 %644  ;;  %v780_v61 = vsel %vm772_vm2, %v1642_v17, %v403_v39 }
 0x105   : > { %436 = vrot.lane.b32.xlu0 %v324_v11, %s1355_s29  ;;  %v866_v12 = vsel %vm857_vm7, %v849_v49, %v645_v20 }
 0x106   : > { %678 = vrot.lane.b32.xlu1 %v1731_v60, %s1358_s5 }
 0x107   : > { %v451_v44 = vpop.permute.xlu0 %450 }
 0x108   : > { %v693_v45 = vpop.permute.xlu1 %692  ;;  %v797_v62 = vsel %vm789_vm3, %v780_v61, %v451_v44 }
 0x109   : > { %484 = vrot.lane.b32.xlu0 %v1829_v30, %s1352_s26  ;;  %v883_v60 = vsel %vm874_vm8, %v866_v12, %v693_v45 }
 0x10a   : > { %726 = vrot.lane.b32.xlu1 %v1740_v25, %s1360_s6 }
 0x10b   : > { %v499_v50 = vpop.permute.xlu0 %498 }
 0x10c   : > { %v741_v51 = vpop.permute.xlu1 %740  ;;  %v814_v0 = vsel %vm806_vm4, %v797_v62, %v499_v50 }
 0x10d   : > { %v900_v54 = vsel %vm891_vm9, %v883_v60, %v741_v51  ;;  %532 = vrot.lane.b32.xlu0 %v1846_v16, %s1356_s30 }
 0x10e   : > { %1240 = vmatpush3.xpose.msk.msra.mxu0 %vm909_vm10, %v900_v54  ;;  %628 = vrot.lane.b32.xlu1 %v1752_v36, %s1354_s28 }
 0x10f   : > { %v547_v25 = vpop.permute.xlu0 %546  ;;  %1241 = vmatprep.subr.mxu0 %v1359_v34 }
 0x110   : > { %v595_v56 = vpop.permute.xlu1 %594  ;;  %v831_v24 = vsel %vm823_vm5, %v814_v0, %v547_v25 }
 0x111   : > { %580 = vrot.lane.b32.xlu0 %v1855_v42, %s1357_s4  ;;  %v848_v42 = vsel %vm840_vm6, %v831_v24, %v595_v56 }
 0x112   : > { %724 = vrot.lane.b32.xlu1 %v1778_v46, %s1360_s6 }
 0x113   : > { %v401_v58 = vpop.permute.xlu0 %400 }
 0x114   : > { %v643_v16 = vpop.permute.xlu1 %642  ;;  %v779_v9 = vsel %vm772_vm2, %v1675_v38, %v401_v58 }
 0x115   : > { %676 = vrot.lane.b32.xlu0 %v1769_v2, %s1358_s5  ;;  %v865_v46 = vsel %vm857_vm7, %v848_v42, %v643_v16 }
 0x117   : > { %v449_v48 = vpop.permute.xlu0 %448 }
 0x118   : > { %v691_v5 = vpop.permute.xlu1 %690  ;;  %v796_v13 = vsel %vm789_vm3, %v779_v9, %v449_v48 }
 0x119   : > { %v882_v7 = vsel %vm874_vm8, %v865_v46, %v691_v5 }
 0x11b   : > { %v497_v6 = vpop.permute.xlu0 %496 }
 0x11c   : > { %v739_v17 = vpop.permute.xlu1 %738  ;;  %v813_v15 = vsel %vm806_vm4, %v796_v13, %v497_v6 }
 0x11d   : > { %v899_v31 = vsel %vm891_vm9, %v882_v7, %v739_v17 }
 0x11e   : > { %1242 = vmatpush3.xpose.msk.msra.mxu0 %vm909_vm10, %v899_v31 }
 0x11f   : > { %v545_v10 = vpop.permute.xlu0 %544  ;;  %1243 = vmatprep.subr.mxu0 %v1359_v34 }
 0x120   : > { %v593_v2 = vpop.permute.xlu1 %592  ;;  %v830_v18 = vsel %vm823_vm5, %v813_v15, %v545_v10 }
 0x121   : > { %v847_v22 = vsel %vm840_vm6, %v830_v18, %v593_v2 }
 0x123   : > { %v399_v8 = vpop.permute.xlu0 %398 }
 0x124   : > { %v641_v57 = vpop.permute.xlu1 %640  ;;  %v778_v47 = vsel %vm772_vm2, %v1713_v4, %v399_v8 }
 0x125   : > { %v864_v23 = vsel %vm857_vm7, %v847_v22, %v641_v57 }
 0x127   : > { %v447_v19 = vpop.permute.xlu0 %446 }
 0x128   : > { %v689_v21 = vpop.permute.xlu1 %688  ;;  %v795_v1 = vsel %vm789_vm3, %v778_v47, %v447_v19 }
 0x129   : > { %v881_v28 = vsel %vm874_vm8, %v864_v23, %v689_v21 }
 0x12b   : > { %v495_v26 = vpop.permute.xlu0 %494 }
 0x12c   : > { %v737_v3 = vpop.permute.xlu1 %736  ;;  %v812_v52 = vsel %vm806_vm4, %v795_v1, %v495_v26 }
 0x12d   : > { %v898_v29 = vsel %vm891_vm9, %v881_v28, %v737_v3 }
 0x12e   : > { %1244 = vmatpush3.xpose.msk.msra.mxu0 %vm909_vm10, %v898_v29 }
 0x12f   : > { %v543_v38 = vpop.permute.xlu0 %542  ;;  %1245 = vmatprep.subr.mxu0 %v1359_v34 }
 0x130   : > { %v591_v33 = vpop.permute.xlu1 %590  ;;  %v829_v32 = vsel %vm823_vm5, %v812_v52, %v543_v38 }
 0x131   : > { %v846_v11 = vsel %vm840_vm6, %v829_v32, %v591_v33 }
 0x133   : > { %v397_v53 = vpop.permute.xlu0 %396 }
 0x134   : > { %v639_v35 = vpop.permute.xlu1 %638  ;;  %v777_v45 = vsel %vm772_vm2, %v1752_v36, %v397_v53 }
 0x135   : > { %v863_v39 = vsel %vm857_vm7, %v846_v11, %v639_v35 }
 0x137   : > { %v445_v14 = vpop.permute.xlu0 %444 }
 0x138   : > { %v687_v37 = vpop.permute.xlu1 %686  ;;  %v794_v12 = vsel %vm789_vm3, %v777_v45, %v445_v14 }
 0x139   : > { %v880_v20 = vsel %vm874_vm8, %v863_v39, %v687_v37 }
 0x13b   : > { %v493_v40 = vpop.permute.xlu0 %492 }
 0x13c   : > { %v735_v63 = vpop.permute.xlu1 %734  ;;  %v811_v50 = vsel %vm806_vm4, %v794_v12, %v493_v40 }
 0x13d   : > { %v897_v41 = vsel %vm891_vm9, %v880_v20, %v735_v63 }
 0x13e   : > { %1246 = vmatpush3.xpose.msk.msra.mxu0 %vm909_vm10, %v897_v41 }
 0x13f   : > { %v541_v4 = vpop.permute.xlu0 %540  ;;  %1247 = vmatprep.subr.mxu0 %v1359_v34 }
 0x140   : > { %v589_v43 = vpop.permute.xlu1 %588  ;;  %v828_v60 = vsel %vm823_vm5, %v811_v50, %v541_v4 }
 0x141   : > { %v845_v25 = vsel %vm840_vm6, %v828_v60, %v589_v43 }
 0x143   : > { %v395_v44 = vpop.permute.xlu0 %394 }
 0x144   : > { %v637_v49 = vpop.permute.xlu1 %636  ;;  %v776_v48 = vsel %vm772_vm2, %v1790_v59, %v395_v44 }
 0x145   : > { %v862_v56 = vsel %vm857_vm7, %v845_v25, %v637_v49 }
 0x147   : > { %v443_v51 = vpop.permute.xlu0 %442 }
 0x148   : > { %v685_v54 = vpop.permute.xlu1 %684  ;;  %v793_v42 = vsel %vm789_vm3, %v776_v48, %v443_v51 }
 0x149   : > { %v879_v61 = vsel %vm874_vm8, %v862_v56, %v685_v54 }
 0x14b   : > { %v491_v58 = vpop.permute.xlu0 %490 }
 0x14c   : > { %v733_v16 = vpop.permute.xlu1 %732  ;;  %v810_v46 = vsel %vm806_vm4, %v793_v42, %v491_v58 }
 0x14d   : > { %v896_v62 = vsel %vm891_vm9, %v879_v61, %v733_v16 }
 0x14e   : > { %1248 = vmatpush3.xpose.msk.msra.mxu0 %vm909_vm10, %v896_v62 }
 0x14f   : > { %v539_v36 = vpop.permute.xlu0 %538  ;;  %1249 = vmatprep.subr.mxu0 %v1359_v34 }
 0x150   : > { %v587_v0 = vpop.permute.xlu1 %586  ;;  %v827_v6 = vsel %vm823_vm5, %v810_v46, %v539_v36 }
 0x151   : > { %v844_v31 = vsel %vm840_vm6, %v827_v6, %v587_v0 }
 0x153   : > { %v393_v24 = vpop.permute.xlu0 %392 }
 0x154   : > { %v635_v5 = vpop.permute.xlu1 %634  ;;  %v775_v18 = vsel %vm772_vm2, %v1829_v30, %v393_v24 }
 0x155   : > { %v861_v10 = vsel %vm857_vm7, %v844_v31, %v635_v5 }
 0x157   : > { %v441_v7 = vpop.permute.xlu0 %440 }
 0x158   : > { %v683_v17 = vpop.permute.xlu1 %682  ;;  %v792_v21 = vsel %vm789_vm3, %v775_v18, %v441_v7 }
 0x159   : > { %v878_v8 = vsel %vm874_vm8, %v861_v10, %v683_v17 }
 0x15b   : > { %v489_v2 = vpop.permute.xlu0 %488 }
 0x15c   : > { %v731_v9 = vpop.permute.xlu1 %730  ;;  %v809_v22 = vsel %vm806_vm4, %v792_v21, %v489_v2 }
 0x15d   : > { %v895_v57 = vsel %vm891_vm9, %v878_v8, %v731_v9 }
 0x15e   : > { %1250 = vmatpush3.xpose.msk.msra.mxu0 %vm909_vm10, %v895_v57 }
 0x15f   : > { %v537_v59 = vpop.permute.xlu0 %536  ;;  %1251 = vmatprep.subr.mxu0 %v1359_v34 }
 0x160   : > { %v585_v13 = vpop.permute.xlu1 %584  ;;  %v826_v23 = vsel %vm823_vm5, %v809_v22, %v537_v59 }
 0x161   : > { %v843_v3 = vsel %vm840_vm6, %v826_v23, %v585_v13 }
 0x163   : > { %v391_v15 = vpop.permute.xlu0 %390 }
 0x164   : > { %v633_v19 = vpop.permute.xlu1 %632  ;;  %v774_v52 = vsel %vm772_vm2, %v1867_v55, %v391_v15 }
 0x165   : > { %v860_v29 = vsel %vm857_vm7, %v843_v3, %v633_v19 }
 0x167   : > { %v439_v26 = vpop.permute.xlu0 %438 }
 0x168   : > { %v681_v28 = vpop.permute.xlu1 %680  ;;  %v791_v14 = vsel %vm789_vm3, %v774_v52, %v439_v26 }
 0x169   : > { %v877_v33 = vsel %vm874_vm8, %v860_v29, %v681_v28 }
 0x16b   : > { %v487_v38 = vpop.permute.xlu0 %486 }
 0x16c   : > { %v729_v53 = vpop.permute.xlu1 %728  ;;  %v808_v37 = vsel %vm806_vm4, %v791_v14, %v487_v38 }
 0x16d   : > { %v894_v47 = vsel %vm891_vm9, %v877_v33, %v729_v53 }
 0x16e   : > { %1252 = vmatpush3.xpose.msk.msra.mxu0 %vm909_vm10, %v894_v47 }
 0x16f   : > { %v535_v30 = vpop.permute.xlu0 %534  ;;  %1253 = vmatprep.subr.mxu0 %v1359_v34 }
 0x170   : > { %v583_v35 = vpop.permute.xlu1 %582  ;;  %v825_v11 = vsel %vm823_vm5, %v808_v37, %v535_v30 }
 0x171   : > { %v842_v20 = vsel %vm840_vm6, %v825_v11, %v583_v35 }
 0x173   : > { %v389_v1 = vpop.permute.xlu0 %388 }
 0x174   : > { %v631_v32 = vpop.permute.xlu1 %630  ;;  %v773_v45 = vsel %vm772_vm2, %v1900_v27, %v389_v1  ;;  %v908_v27 = vld [vmem:[%s2067_s1] sm:$0xff] }
 0x175   : > { %v859_v63 = vsel %vm857_vm7, %v842_v20, %v631_v32 }
 0x177   : > { %v437_v39 = vpop.permute.xlu0 %436 }
 0x178   : > { %v679_v40 = vpop.permute.xlu1 %678  ;;  %v790_v12 = vsel %vm789_vm3, %v773_v45, %v437_v39 }
 0x179   : > { %v876_v4 = vsel %vm874_vm8, %v859_v63, %v679_v40 }
 0x17b   : > { %v485_v41 = vpop.permute.xlu0 %484 }
 0x17c   : > { %v727_v43 = vpop.permute.xlu1 %726  ;;  %v807_v50 = vsel %vm806_vm4, %v790_v12, %v485_v41 }
 0x17d   : > { %v893_v44 = vsel %vm891_vm9, %v876_v4, %v727_v43 }
 0x17e   : > { %1254 = vmatpush3.xpose.msk.msra.mxu0 %vm909_vm10, %v893_v44 }
 0x17f   : > { %v533_v55 = vpop.permute.xlu0 %532  ;;  %1255 = vmatprep.subr.mxu0 %v1359_v34 }
 0x180   : > { %v629_v49 = vpop.permute.xlu1 %628  ;;  %v824_v60 = vsel %vm823_vm5, %v807_v50, %v533_v55 }
 0x183   : > { %v581_v51 = vpop.permute.xlu0 %580 }
 0x184   : > { %v841_v54 = vsel %vm840_vm6, %v824_v60, %v581_v51  ;;  %v725_v25 = vpop.permute.xlu1 %724 }
 0x185   : > { %v858_v56 = vsel %vm857_vm7, %v841_v54, %v629_v49 }
 0x187   : > { %v677_v58 = vpop.permute.xlu0 %676 }
 0x188   : > { %v875_v34 = vsel %vm874_vm8, %v858_v56, %v677_v58 }
 0x189   : > { %v892_v61 = vsel %vm891_vm9, %v875_v34, %v725_v25 }
 0x18a   : > { %1256 = vmatpush3.xpose.msk.msra.mxu0 %vm909_vm10, %v892_v61 }
 0x18d   : > { %1258 = vmatmul.mubr.msk.f32.vlgmr.msra.gmra.mxu0 %vm909_vm10, %v908_v27 }
 0x24d   : > { %v1027_v16 = vpop.f32.mrf.mxu0 }
 0x24e   : > { %1031 = vst [vmem:[%s217_s21] sm:$0xff] %v1027_v16  ;;  %1032 = vadd.xlane.f32.xlu0 %v1027_v16 }
 0x24f   : > { %v1259_v62 = vpop.f32.mrf.mxu0 }
 0x2d7   : > { %v1033_v36 = vpop.xlane.xlu0 %1032 }
 0x2d8   : > { %v1034_v0 = vmul.f32 0.0078125, %v1033_v36 }
 0x2da   : > { %v1035_v24 = vsub.f32 %v1027_v16, %v1034_v0 }
 0x2dc   : > { %v1036_v48 = vmul.f32 %v1035_v24, %v1035_v24 }
 0x2de   : > { %1037 = vadd.xlane.f32.xlu1 %v1036_v48 }
 0x367   : > { %v1038_v5 = vpop.xlane.xlu1 %1037 }
 0x368   : > { %v1040_v42 = vsel %vm1039_vm12, %v1033_v36, %v1038_v5 }
 0x369   : > { %1042 = vst.msk [vmem:[%s225_s13] sm:$0xff] %vm1041_vm13, %v1040_v42 }
 0x36a PF: > { %s14_s16 = sadd.s32 1, %s1350_s16   ;;  %s2070_s12 = smov %s1342_s14 }
 0x36b   : > { %p11_p7 = scmp.ge.s32.totalorder %s14_s16, 6   ;;  %s2071_s13 = smov %s1346_s15 }
 0x36c   : > { %s2072_s14 = smov %s2075_s17  ;;  %s2073_s15 = smov %s2079_s18 }
 0x36d   :  { %13 = sbr.rel (!%p11_p7) target bundleno = 3 (0x3), region = 70 }

</bundles_post_ra>
